<compile_context>
chip_gen: v6e
topology: v6e:2x2x1
jax: 0.10.0
libtpu: 0.0.40
codegen_flags: <defaults>
</compile_context>

<pallas_src>
import math
from functools import partial

import jax
import jax.numpy as jnp
from jax import lax
from jax.experimental import pallas as pl
from jax.experimental.pallas import tpu as pltpu


def _posconv_kernel(x_ref, h_ref, w_ref, b_ref, o_ref, *, C):
    # x_ref: (1, TH, WC)   current tile of rows (storage dtype)
    # h_ref: (1, 1, 2, WC) halo rows: [row above tile, row below tile]
    #                      (zeros at the image boundary -> conv zero padding)
    # w_ref: (9, WC)       lane-tiled f32 taps, flattened as (ky*3 + kx, lane);
    #                      centre tap already has +1 residual folded in and the
    #                      kx=0 / kx=2 taps are zeroed on edge-column lanes
    # b_ref: (1, WC)       lane-tiled f32 bias
    # o_ref: (1, TH, WC)   output tile
    TH = x_ref.shape[1]
    WC = x_ref.shape[2]

    # Hoisted upcasts (few converts instead of per-multiply promotion).
    x = x_ref[0].astype(jnp.float32)                    # (TH, WC)
    h = h_ref[...].reshape(2, WC).astype(jnp.float32)   # (2, WC)

    # Column-neighbour views via lane rolls (XLU slot, VALU stays free):
    #   xl[r, j] = x[r, j - C]  -> value from column w-1 (pairs with kx=0 taps)
    #   xr[r, j] = x[r, j + C]  -> value from column w+1 (pairs with kx=2 taps)
    # Wrapped edge lanes hit zeroed taps, so no extra masking is needed.
    xl = pltpu.roll(x, C, axis=1)
    xr = pltpu.roll(x, WC - C, axis=1)
    hl = pltpu.roll(h, C, axis=1)
    hr = pltpu.roll(h, WC - C, axis=1)

    bias = b_ref[0]

    # Per-input-row partial sums for each kernel row (all f32).
    s_top = xl * w_ref[0] + x * w_ref[1] + xr * w_ref[2]          # -> row below
    s_mid = bias + xl * w_ref[3] + x * w_ref[4] + xr * w_ref[5]   # -> own row
    s_bot = xl * w_ref[6] + x * w_ref[7] + xr * w_ref[8]          # -> row above

    # Same partial sums for the two halo rows.
    top_h = hl[0:1] * w_ref[0] + h[0:1] * w_ref[1] + hr[0:1] * w_ref[2]   # (1, WC)
    bot_h = hl[1:2] * w_ref[6] + h[1:2] * w_ref[7] + hr[1:2] * w_ref[8]   # (1, WC)

    # Row shifts via sublane rolls; the single wrapped row is replaced by the
    # halo contribution (which is zero at the image top/bottom).
    row = lax.broadcasted_iota(jnp.int32, (TH, 1), 0)
    top = jnp.where(row == 0, top_h, pltpu.roll(s_top, 1, axis=0))
    bot = jnp.where(row == TH - 1, bot_h, pltpu.roll(s_bot, TH - 1, axis=0))

    o_ref[0] = (s_mid + top + bot).astype(o_ref.dtype)


def _pick_tile_h(H, WC, itemsize):
    """Largest row tile TH (multiple of 8 dividing H) keeping double-buffered
    in+out blocks bounded and, when the image allows it, >= 2 tiles."""
    budget = 8 * 1024 * 1024
    cap = max(8, budget // max(1, 4 * WC * itemsize))
    cands = [th for th in range(8, H + 1, 8) if H % th == 0 and th <= cap]
    if not cands:
        return H                        # tiny / awkward H: whole image per step
    small = [th for th in cands if 2 * th <= H]
    return max(small) if small else max(cands)


def pos_conv(x, weight, bias, size):
    """x: (B, N, C); weight: (3, 3, C) or PyTorch (C, 1, 3, 3); bias: (C,)."""
    B, N, C = x.shape
    H, W = size
    assert N == H * W, "sequence length must equal H*W"
    if weight.shape == (C, 1, 3, 3):                    # PyTorch depthwise layout
        weight = jnp.transpose(weight[:, 0], (1, 2, 0))
    assert weight.shape == (3, 3, C), f"expected (3,3,C), got {weight.shape}"
    assert bias.shape == (C,)

    # Pad channels (only when cheap) so the lane axis W*C is a multiple of 128:
    # unmasked full-width stores instead of masked vst on narrow lane widths.
    c_step = 128 // math.gcd(W, 128)
    c_pad = -(-C // c_step) * c_step
    if c_pad != C and c_pad <= 2 * C:
        pad = c_pad - C
        x_in = jnp.pad(x, ((0, 0), (0, 0), (0, pad)))
        w_in = jnp.pad(weight, ((0, 0), (0, 0), (0, pad)))
        b_in = jnp.pad(bias, ((0, pad),))
        Ck = c_pad
    else:
        x_in, w_in, b_in, Ck = x, weight, bias, C

    WC = W * Ck
    x2d = x_in.reshape(B, H, WC)          # free reshape: same memory layout
    itemsize = x2d.dtype.itemsize

    TH = _pick_tile_h(H, WC, itemsize)
    nT = H // TH

    # 1-row halos per tile: row above / row below (zeros at the image edge).
    zero_row = jnp.zeros((B, 1, WC), x2d.dtype)
    above = jnp.concatenate([zero_row, x2d[:, TH - 1:H - 1:TH, :]], axis=1)
    below = jnp.concatenate([x2d[:, TH::TH, :], zero_row], axis=1)
    halos = jnp.stack([above, below], axis=2)            # (B, nT, 2, WC)

    # Lane-tiled parameters (tiny one-off wrapper work).
    w_eff = w_in.astype(jnp.float32).at[1, 1, :].add(1.0)    # fold residual
    w_t = jnp.tile(w_eff, (1, 1, W))                          # (3, 3, WC)
    lane = jnp.arange(WC)
    w_t = w_t.at[:, 0, :].set(jnp.where(lane < Ck, 0.0, w_t[:, 0, :]))
    w_t = w_t.at[:, 2, :].set(jnp.where(lane >= WC - Ck, 0.0, w_t[:, 2, :]))
    w9 = w_t.reshape(9, WC)
    b_t = jnp.tile(b_in.astype(jnp.float32), W).reshape(1, WC)

    # Explicit VMEM limit derived from the block sizes (generous headroom).
    blk = TH * WC * itemsize
    est = 4 * blk + 4 * 2 * WC * itemsize + 48 * WC * 4
    vmem_limit = int(min(64 << 20, max(32 << 20, 2 * est)))

    out = pl.pallas_call(
        partial(_posconv_kernel, C=Ck),
        out_shape=jax.ShapeDtypeStruct((B, H, WC), x2d.dtype),
        grid_spec=pltpu.PrefetchScalarGridSpec(
            num_scalar_prefetch=0,
            grid=(B, nT),
            in_specs=[
                pl.BlockSpec((1, TH, WC), lambda b, t: (b, t, 0)),
                pl.BlockSpec((1, 1, 2, WC), lambda b, t: (b, t, 0, 0)),
                pl.BlockSpec((9, WC), lambda b, t: (0, 0)),
                pl.BlockSpec((1, WC), lambda b, t: (0, 0)),
            ],
            out_specs=pl.BlockSpec((1, TH, WC), lambda b, t: (b, t, 0)),
        ),
        compiler_params=pltpu.CompilerParams(
            dimension_semantics=("parallel", "parallel"),
            vmem_limit_bytes=vmem_limit,
        ),
    )(x2d, halos, w9, b_t)

    out = out.reshape(B, N, Ck)
    return out[:, :, :C] if Ck != C else out


def _reference(x, weight, bias, size):
    """Pure-JAX reference: depthwise 3x3 conv (pad=1) + bias + residual."""
    B, N, C = x.shape
    H, W = size
    x_img = x.reshape(B, H, W, C)
    xp = jnp.pad(x_img, ((0, 0), (1, 1), (1, 1), (0, 0)))
    y = jnp.zeros((B, H, W, C), jnp.float32)
    for ky in range(3):
        for kx in range(3):
            y = y + xp[:, ky:ky + H, kx:kx + W, :].astype(jnp.float32) * weight[ky, kx, :]
    y = y + bias.astype(jnp.float32) + x_img.astype(jnp.float32)
    return y.reshape(B, N, C).astype(x.dtype)


if __name__ == "__main__":
    key = jax.random.PRNGKey(0)
    B, C, H, W = 2, 4, 16, 16
    N = H * W

    k1, k2, k3 = jax.random.split(key, 3)
    x = jax.random.normal(k1, (B, N, C), dtype=jnp.float32)
    # Depthwise conv taps stored as (3, 3, C); (C,1,3,3) also accepted by pos_conv.
    weight = jax.random.normal(k2, (3, 3, C), dtype=jnp.float32) * 0.1
    bias = jax.random.normal(k3, (C,), dtype=jnp.float32) * 0.1

    out = pos_conv(x, weight, bias, (H, W))
    out = jax.block_until_ready(out)

    ref = _reference(x, weight, bias, (H, W))
    assert out.shape == (B, N, C)
    assert jnp.allclose(out, ref, atol=1e-5, rtol=1e-5), "mismatch vs reference"

    print("KERNEL_OK")
</pallas_src>

<mosaic_0001>
module attributes {stable_mosaic.version = 11 : i64} {
  func.func @_posconv_kernel(%arg0: i32, %arg1: i32, %arg2: memref<1x8x128xf32, #tpu.memory_space<vmem>>, %arg3: memref<1x1x2x128xf32, #tpu.memory_space<vmem>>, %arg4: memref<9x128xf32, #tpu.memory_space<vmem>>, %arg5: memref<1x128xf32, #tpu.memory_space<vmem>>, %arg6: memref<1x8x128xf32, #tpu.memory_space<vmem>>) attributes {dimension_semantics = [#tpu.dimension_semantics<parallel>, #tpu.dimension_semantics<parallel>], iteration_bounds = array<i64: 2, 2>, scalar_prefetch = 0 : i64, scratch_operands = 0 : i64, tpu.core_type = #tpu.core_type<tc>, window_params = [{transform_indices = @transform_0, window_bounds = array<i64: 1, 8, 128>}, {transform_indices = @transform_1, window_bounds = array<i64: 1, 1, 2, 128>}, {pipeline_mode = #tpu.pipeline_mode<synchronous>, transform_indices = @transform_2, window_bounds = array<i64: 9, 128>}, {pipeline_mode = #tpu.pipeline_mode<synchronous>, transform_indices = @transform_3, window_bounds = array<i64: 1, 128>}, {transform_indices = @transform_4, window_bounds = array<i64: 1, 8, 128>}]} {
    %c0 = arith.constant 0 : index
    %c0_0 = arith.constant 0 : index
    %c0_1 = arith.constant 0 : index
    %0 = vector.load %arg2[%c0, %c0_0, %c0_1] : memref<1x8x128xf32, #tpu.memory_space<vmem>>, vector<1x8x128xf32>
    %1 = vector.shape_cast %0 : vector<1x8x128xf32> to vector<8x128xf32>
    %c0_2 = arith.constant 0 : index
    %c0_3 = arith.constant 0 : index
    %c0_4 = arith.constant 0 : index
    %c0_5 = arith.constant 0 : index
    %2 = vector.load %arg3[%c0_2, %c0_3, %c0_4, %c0_5] : memref<1x1x2x128xf32, #tpu.memory_space<vmem>>, vector<1x1x2x128xf32>
    %3 = vector.shape_cast %2 : vector<1x1x2x128xf32> to vector<2x128xf32>
    %c8_i32 = arith.constant 8 : i32
    %4 = tpu.dynamic_rotate %1 by %c8_i32 dim 1 : vector<8x128xf32>, i32 -> vector<8x128xf32>
    %c120_i32 = arith.constant 120 : i32
    %5 = tpu.dynamic_rotate %1 by %c120_i32 dim 1 : vector<8x128xf32>, i32 -> vector<8x128xf32>
    %c8_i32_6 = arith.constant 8 : i32
    %6 = tpu.dynamic_rotate %3 by %c8_i32_6 dim 1 : vector<2x128xf32>, i32 -> vector<2x128xf32>
    %c120_i32_7 = arith.constant 120 : i32
    %7 = tpu.dynamic_rotate %3 by %c120_i32_7 dim 1 : vector<2x128xf32>, i32 -> vector<2x128xf32>
    %c0_8 = arith.constant 0 : index
    %c0_9 = arith.constant 0 : index
    %8 = vector.load %arg5[%c0_8, %c0_9] : memref<1x128xf32, #tpu.memory_space<vmem>>, vector<1x128xf32>
    %9 = vector.shape_cast %8 : vector<1x128xf32> to vector<128xf32>
    %c0_10 = arith.constant 0 : index
    %c0_11 = arith.constant 0 : index
    %10 = vector.load %arg4[%c0_10, %c0_11] : memref<9x128xf32, #tpu.memory_space<vmem>>, vector<1x128xf32>
    %11 = vector.shape_cast %10 : vector<1x128xf32> to vector<128xf32>
    %12 = vector.shape_cast %11 : vector<128xf32> to vector<1x128xf32>
    %13 = vector.broadcast %12 : vector<1x128xf32> to vector<8x128xf32>
    %14 = arith.mulf %4, %13 : vector<8x128xf32>
    %c1 = arith.constant 1 : index
    %c0_12 = arith.constant 0 : index
    %15 = vector.load %arg4[%c1, %c0_12] : memref<9x128xf32, #tpu.memory_space<vmem>>, vector<1x128xf32>
    %16 = vector.shape_cast %15 : vector<1x128xf32> to vector<128xf32>
    %17 = vector.shape_cast %16 : vector<128xf32> to vector<1x128xf32>
    %18 = vector.broadcast %17 : vector<1x128xf32> to vector<8x128xf32>
    %19 = arith.mulf %1, %18 : vector<8x128xf32>
    %20 = arith.addf %14, %19 : vector<8x128xf32>
    %c2 = arith.constant 2 : index
    %c0_13 = arith.constant 0 : index
    %21 = vector.load %arg4[%c2, %c0_13] : memref<9x128xf32, #tpu.memory_space<vmem>>, vector<1x128xf32>
    %22 = vector.shape_cast %21 : vector<1x128xf32> to vector<128xf32>
    %23 = vector.shape_cast %22 : vector<128xf32> to vector<1x128xf32>
    %24 = vector.broadcast %23 : vector<1x128xf32> to vector<8x128xf32>
    %25 = arith.mulf %5, %24 : vector<8x128xf32>
    %26 = arith.addf %20, %25 : vector<8x128xf32>
    %c3 = arith.constant 3 : index
    %c0_14 = arith.constant 0 : index
    %27 = vector.load %arg4[%c3, %c0_14] : memref<9x128xf32, #tpu.memory_space<vmem>>, vector<1x128xf32>
    %28 = vector.shape_cast %27 : vector<1x128xf32> to vector<128xf32>
    %29 = vector.shape_cast %28 : vector<128xf32> to vector<1x128xf32>
    %30 = vector.broadcast %29 : vector<1x128xf32> to vector<8x128xf32>
    %31 = arith.mulf %4, %30 : vector<8x128xf32>
    %32 = vector.shape_cast %9 : vector<128xf32> to vector<1x128xf32>
    %33 = vector.broadcast %32 : vector<1x128xf32> to vector<8x128xf32>
    %34 = arith.addf %33, %31 : vector<8x128xf32>
    %c4 = arith.constant 4 : index
    %c0_15 = arith.constant 0 : index
    %35 = vector.load %arg4[%c4, %c0_15] : memref<9x128xf32, #tpu.memory_space<vmem>>, vector<1x128xf32>
    %36 = vector.shape_cast %35 : vector<1x128xf32> to vector<128xf32>
    %37 = vector.shape_cast %36 : vector<128xf32> to vector<1x128xf32>
    %38 = vector.broadcast %37 : vector<1x128xf32> to vector<8x128xf32>
    %39 = arith.mulf %1, %38 : vector<8x128xf32>
    %40 = arith.addf %34, %39 : vector<8x128xf32>
    %c5 = arith.constant 5 : index
    %c0_16 = arith.constant 0 : index
    %41 = vector.load %arg4[%c5, %c0_16] : memref<9x128xf32, #tpu.memory_space<vmem>>, vector<1x128xf32>
    %42 = vector.shape_cast %41 : vector<1x128xf32> to vector<128xf32>
    %43 = vector.shape_cast %42 : vector<128xf32> to vector<1x128xf32>
    %44 = vector.broadcast %43 : vector<1x128xf32> to vector<8x128xf32>
    %45 = arith.mulf %5, %44 : vector<8x128xf32>
    %46 = arith.addf %40, %45 : vector<8x128xf32>
    %c6 = arith.constant 6 : index
    %c0_17 = arith.constant 0 : index
    %47 = vector.load %arg4[%c6, %c0_17] : memref<9x128xf32, #tpu.memory_space<vmem>>, vector<1x128xf32>
    %48 = vector.shape_cast %47 : vector<1x128xf32> to vector<128xf32>
    %49 = vector.shape_cast %48 : vector<128xf32> to vector<1x128xf32>
    %50 = vector.broadcast %49 : vector<1x128xf32> to vector<8x128xf32>
    %51 = arith.mulf %4, %50 : vector<8x128xf32>
    %c7 = arith.constant 7 : index
    %c0_18 = arith.constant 0 : index
    %52 = vector.load %arg4[%c7, %c0_18] : memref<9x128xf32, #tpu.memory_space<vmem>>, vector<1x128xf32>
    %53 = vector.shape_cast %52 : vector<1x128xf32> to vector<128xf32>
    %54 = vector.shape_cast %53 : vector<128xf32> to vector<1x128xf32>
    %55 = vector.broadcast %54 : vector<1x128xf32> to vector<8x128xf32>
    %56 = arith.mulf %1, %55 : vector<8x128xf32>
    %57 = arith.addf %51, %56 : vector<8x128xf32>
    %c8 = arith.constant 8 : index
    %c0_19 = arith.constant 0 : index
    %58 = vector.load %arg4[%c8, %c0_19] : memref<9x128xf32, #tpu.memory_space<vmem>>, vector<1x128xf32>
    %59 = vector.shape_cast %58 : vector<1x128xf32> to vector<128xf32>
    %60 = vector.shape_cast %59 : vector<128xf32> to vector<1x128xf32>
    %61 = vector.broadcast %60 : vector<1x128xf32> to vector<8x128xf32>
    %62 = arith.mulf %5, %61 : vector<8x128xf32>
    %63 = arith.addf %57, %62 : vector<8x128xf32>
    %64 = vector.extract_strided_slice %6 {offsets = [0, 0], sizes = [1, 128], strides = [1, 1]} : vector<2x128xf32> to vector<1x128xf32>
    %c0_20 = arith.constant 0 : index
    %c0_21 = arith.constant 0 : index
    %65 = vector.load %arg4[%c0_20, %c0_21] : memref<9x128xf32, #tpu.memory_space<vmem>>, vector<1x128xf32>
    %66 = vector.shape_cast %65 : vector<1x128xf32> to vector<128xf32>
    %67 = vector.shape_cast %66 : vector<128xf32> to vector<1x128xf32>
    %68 = arith.mulf %64, %67 : vector<1x128xf32>
    %69 = vector.extract_strided_slice %3 {offsets = [0, 0], sizes = [1, 128], strides = [1, 1]} : vector<2x128xf32> to vector<1x128xf32>
    %c1_22 = arith.constant 1 : index
    %c0_23 = arith.constant 0 : index
    %70 = vector.load %arg4[%c1_22, %c0_23] : memref<9x128xf32, #tpu.memory_space<vmem>>, vector<1x128xf32>
    %71 = vector.shape_cast %70 : vector<1x128xf32> to vector<128xf32>
    %72 = vector.shape_cast %71 : vector<128xf32> to vector<1x128xf32>
    %73 = arith.mulf %69, %72 : vector<1x128xf32>
    %74 = arith.addf %68, %73 : vector<1x128xf32>
    %75 = vector.extract_strided_slice %7 {offsets = [0, 0], sizes = [1, 128], strides = [1, 1]} : vector<2x128xf32> to vector<1x128xf32>
    %c2_24 = arith.constant 2 : index
    %c0_25 = arith.constant 0 : index
    %76 = vector.load %arg4[%c2_24, %c0_25] : memref<9x128xf32, #tpu.memory_space<vmem>>, vector<1x128xf32>
    %77 = vector.shape_cast %76 : vector<1x128xf32> to vector<128xf32>
    %78 = vector.shape_cast %77 : vector<128xf32> to vector<1x128xf32>
    %79 = arith.mulf %75, %78 : vector<1x128xf32>
    %80 = arith.addf %74, %79 : vector<1x128xf32>
    %81 = vector.extract_strided_slice %6 {offsets = [1, 0], sizes = [1, 128], strides = [1, 1]} : vector<2x128xf32> to vector<1x128xf32>
    %c6_26 = arith.constant 6 : index
    %c0_27 = arith.constant 0 : index
    %82 = vector.load %arg4[%c6_26, %c0_27] : memref<9x128xf32, #tpu.memory_space<vmem>>, vector<1x128xf32>
    %83 = vector.shape_cast %82 : vector<1x128xf32> to vector<128xf32>
    %84 = vector.shape_cast %83 : vector<128xf32> to vector<1x128xf32>
    %85 = arith.mulf %81, %84 : vector<1x128xf32>
    %86 = vector.extract_strided_slice %3 {offsets = [1, 0], sizes = [1, 128], strides = [1, 1]} : vector<2x128xf32> to vector<1x128xf32>
    %c7_28 = arith.constant 7 : index
    %c0_29 = arith.constant 0 : index
    %87 = vector.load %arg4[%c7_28, %c0_29] : memref<9x128xf32, #tpu.memory_space<vmem>>, vector<1x128xf32>
    %88 = vector.shape_cast %87 : vector<1x128xf32> to vector<128xf32>
    %89 = vector.shape_cast %88 : vector<128xf32> to vector<1x128xf32>
    %90 = arith.mulf %86, %89 : vector<1x128xf32>
    %91 = arith.addf %85, %90 : vector<1x128xf32>
    %92 = vector.extract_strided_slice %7 {offsets = [1, 0], sizes = [1, 128], strides = [1, 1]} : vector<2x128xf32> to vector<1x128xf32>
    %c8_30 = arith.constant 8 : index
    %c0_31 = arith.constant 0 : index
    %93 = vector.load %arg4[%c8_30, %c0_31] : memref<9x128xf32, #tpu.memory_space<vmem>>, vector<1x128xf32>
    %94 = vector.shape_cast %93 : vector<1x128xf32> to vector<128xf32>
    %95 = vector.shape_cast %94 : vector<128xf32> to vector<1x128xf32>
    %96 = arith.mulf %92, %95 : vector<1x128xf32>
    %97 = arith.addf %91, %96 : vector<1x128xf32>
    %98 = tpu.iota {dimensions = array<i32: 0>} : vector<8x1xi32>
    %c0_i32 = arith.constant 0 : i32
    %99 = vector.broadcast %c0_i32 : i32 to vector<8x1xi32>
    %100 = arith.cmpi eq, %98, %99 : vector<8x1xi32>
    %c1_i32 = arith.constant 1 : i32
    %101 = tpu.dynamic_rotate %26 by %c1_i32 dim 0 : vector<8x128xf32>, i32 -> vector<8x128xf32>
    %102 = vector.shape_cast %100 : vector<8x1xi1> to vector<8x1xi1>
    %103 = vector.broadcast %102 : vector<8x1xi1> to vector<8x128xi1>
    %104 = vector.shape_cast %80 : vector<1x128xf32> to vector<1x128xf32>
    %105 = vector.broadcast %104 : vector<1x128xf32> to vector<8x128xf32>
    %106 = arith.select %103, %105, %101 : vector<8x128xi1>, vector<8x128xf32>
    %c7_i32 = arith.constant 7 : i32
    %107 = vector.broadcast %c7_i32 : i32 to vector<8x1xi32>
    %108 = arith.cmpi eq, %98, %107 : vector<8x1xi32>
    %c7_i32_32 = arith.constant 7 : i32
    %109 = tpu.dynamic_rotate %63 by %c7_i32_32 dim 0 : vector<8x128xf32>, i32 -> vector<8x128xf32>
    %110 = vector.shape_cast %108 : vector<8x1xi1> to vector<8x1xi1>
    %111 = vector.broadcast %110 : vector<8x1xi1> to vector<8x128xi1>
    %112 = vector.shape_cast %97 : vector<1x128xf32> to vector<1x128xf32>
    %113 = vector.broadcast %112 : vector<1x128xf32> to vector<8x128xf32>
    %114 = arith.select %111, %113, %109 : vector<8x128xi1>, vector<8x128xf32>
    %115 = arith.addf %46, %106 : vector<8x128xf32>
    %116 = arith.addf %115, %114 : vector<8x128xf32>
    %c0_33 = arith.constant 0 : index
    %c0_34 = arith.constant 0 : index
    %c0_35 = arith.constant 0 : index
    %117 = vector.load %arg6[%c0_33, %c0_34, %c0_35] : memref<1x8x128xf32, #tpu.memory_space<vmem>>, vector<1x8x128xf32>
    %118 = vector.shape_cast %117 : vector<1x8x128xf32> to vector<8x128xf32>
    %119 = vector.shape_cast %116 : vector<8x128xf32> to vector<1x8x128xf32>
    tpu.vector_store %arg6[%c0_33, %c0_34, %c0_35], %119 {strides = array<i32>} : memref<1x8x128xf32, #tpu.memory_space<vmem>>, vector<1x8x128xf32>,
    return
  }
  func.func @transform_0(%arg0: i32, %arg1: i32) -> (i32, i32, i32) {
    %c0_i32 = arith.constant 0 : i32
    %c0_i32_0 = arith.constant 0 : i32
    return %arg0, %arg1, %c0_i32 : i32, i32, i32
  }
  func.func @transform_1(%arg0: i32, %arg1: i32) -> (i32, i32, i32, i32) {
    %c0_i32 = arith.constant 0 : i32
    %c0_i32_0 = arith.constant 0 : i32
    %c0_i32_1 = arith.constant 0 : i32
    return %arg0, %arg1, %c0_i32, %c0_i32_0 : i32, i32, i32, i32
  }
  func.func @transform_2(%arg0: i32, %arg1: i32) -> (i32, i32) {
    %c0_i32 = arith.constant 0 : i32
    %c0_i32_0 = arith.constant 0 : i32
    %c0_i32_1 = arith.constant 0 : i32
    return %c0_i32, %c0_i32_0 : i32, i32
  }
  func.func @transform_3(%arg0: i32, %arg1: i32) -> (i32, i32) {
    %c0_i32 = arith.constant 0 : i32
    %c0_i32_0 = arith.constant 0 : i32
    %c0_i32_1 = arith.constant 0 : i32
    return %c0_i32, %c0_i32_0 : i32, i32
  }
  func.func @transform_4(%arg0: i32, %arg1: i32) -> (i32, i32, i32) {
    %c0_i32 = arith.constant 0 : i32
    %c0_i32_0 = arith.constant 0 : i32
    return %arg0, %arg1, %c0_i32 : i32, i32, i32
  }
}

</mosaic_0001>

<bundles_post_ra>
// kernel: tpu_custom_call.1
= control target key start
LH: loop header
LB: loop body
LE: loop exit
PB: predicated region body
PF: predicated region fallthrough
CT: control target
= control target key end

     0   :  { %s1100_s0 = inlined_call_operand.hbm [shape: f32[2,16,128], index: 0, kind: input, shape index: {}]   ;;  %s1101_s1 = inlined_call_operand.hbm [shape: f32[2,2,2,128], index: 1, kind: input, shape index: {}]   ;;  %s1102_s2 = inlined_call_operand.hbm [shape: f32[9,128], index: 2, kind: input, shape index: {}]   ;;  %s1103_s3 = inlined_call_operand.vmem [shape: f32[1,128], index: 3, kind: input, shape index: {}]   ;;  %s1104_s4 = inlined_call_operand.hbm [shape: f32[2,16,128], index: 4, kind: output, shape index: {}]  }
   0x1   :  { %1112 = sst [smem:[#allocation18_spill]] %s1100_s0 }
   0x2   :  { %1113 = sst [smem:[#allocation19_spill]] %s1102_s2 }
   0x3   :  { %1114 = sst [smem:[#allocation20_spill]] %s1104_s4 }
   0x4   :  { %9 = vsyncpa [#allocation3], 0 }
   0x5   :  { %11 = vsyncpa [#allocation3 + $0x1], 0 }
   0x6   :  { %12 = vsyncpa [#allocation6], 0 }
   0x7   :  { %14 = vsyncpa [#allocation6 + $0x1], 0 }
   0x8   :  { %15 = vsyncpa [#allocation4], 0 }
   0x9   :  { %17 = vsyncpa [#allocation4 + $0x1], 0  ;;  %s885_s15 = smov 0   ;;  %s887_s16 = smov 0  }
   0xa   :  { %s889_s17 = smov 0   ;;  %s891_s18 = smov 0  }
   0xb   :  { %s893_s19 = smov 0   ;;  %s895_s20 = smov 0  }
   0xc   :  { %s897_s21 = smov 0   ;;  %s899_s22 = smov 0  }
   0xd LB: > { %1115 = sst [smem:[#allocation13_spill]] %s822_s15  ;;  %s926_s23 = sadd.s32 4294967295, %s850_s22   ;;  %s850_s22 = sphi %s899_s22, %s23_s22   ;;  %s846_s21 = sphi %s897_s21, %s1142_s21   ;;  %s842_s20 = sphi %s895_s20, %s1141_s20   ;;  %s838_s19 = sphi %s893_s19, %s1140_s19   ;;  %s834_s18 = sphi %s891_s18, %s1139_s18   ;;  %s830_s17 = sphi %s889_s17, %s1138_s17   ;;  %s826_s16 = sphi %s887_s16, %s1137_s16   ;;  %s822_s15 = sphi %s885_s15, %s1136_s15  }
   0xe   : > { %s542_s24 = sadd.s32 4294967294, %s850_s22   ;;  %p57_p0 = scmp.ne.s32.totalorder %s826_s16, %s822_s15 }
   0xf   : > { %p58_p1 = scmp.eq.s32.totalorder %s926_s23, 0  ;;  %p159_p3 = scmp.eq.s32.totalorder %s542_s24, 3 }
  0x10   : > { %p543_p5 = scmp.ge.s32.totalorder %s850_s22, 1  ;;  %p166_p7 = scmp.lt.s32.totalorder %s850_s22, 5 }
  0x11   : > { %p935_p4 = por %p58_p1, %p57_p0  ;;  %p940_p6 = por %p159_p3, %p57_p0 }
  0x12   : > { %p945_p8 = pnand %p543_p5, %p166_p7  ;;  %s852_s28 = smov [#allocation7]  }
  0x13   : > { %s1117_s26 = scalar_select %p940_p6, 1, 0 }
  0x14   : > { %s178_s29 = sshll.u32 %s852_s28, 4  ;;  %p576_p9 = pneg %p945_p8  ;;  %s179_s29 = int_to_ptr.vmem [resolvable:$true] %s178_s29 }
  0x15   : > { %1118 = sst [smem:[#allocation14_spill]] %s1117_s26  ;;  %s675_s30 = scalar_lea.vmem %s179_s29, 256 }
  0x16   : > { %p577_p10 = pnand %p576_p9, %p58_p1  ;;  %p676_p12 = scmp.ne.s32.totalorder %s179_s29, %s675_s30 }
  0x17   : > { %p683_p3 = scmp.lt.s32.totalorder %s179_s29, %s179_s29  ;;  %p684_p2 = scmp.lt.s32.totalorder %s675_s30, %s675_s30 }
  0x18   : > { %p666_p11 = pneg %p577_p10 }
  0x19   : > { %p685_p6 = por %p684_p2, %p683_p3 }
  0x1a   : > { %p678_p13 = pnand %p676_p12, %p666_p11 }
  0x1c   : > { %p679_p0 = pneg %p678_p13 }
  0x1e   : > { %p686_p5 = pnand %p685_p6, %p679_p0 }
  0x20   : > { %689 = shalt.err (!%p686_p5)
}
  0x21   : > { %s853_s5 = smov 128   ;;  %s854_s6 = smov 8  }
  0x22   : > { %s1120_s2 = sld [smem:[#allocation19_spill]]  ;;  %s32_s9 = sadd.s32 1, %s842_s20 }
  0x23   : > { %p33_p2 = scmp.ge.s32.totalorder %s32_s9, 2  ;;  %s35_s10 = sadd.s32 1, %s846_s21 }
  0x24   : > { %s44_s11 = sadd.s32 1, %s830_s17  ;;  %p51_p6 = scmp.ne.s32.totalorder %s830_s17, %s826_s16 }
  0x25   : > { %s1144_s9 = smov (%p33_p2, %s32_s9), 0  ;;  %s1146_s10 = smov (!%p33_p2, %s35_s10), %s846_s21 }
  0x26   : > { %1121 = sst [smem:[#allocation15_spill]] %s1144_s9  ;;  %s40_s12 = ssub.s32 %s842_s20, %s1144_s9 }
  0x27   : > { %p52_p7 = scmp.eq.s32.totalorder %s850_s22, 0  ;;  %p37_p9 = scmp.ge.s32.totalorder %s1146_s10, 2 }
  0x28   : > { %579 = dma.hbm_to_vmem [thread:$0]  (!%p577_p10), %s1120_s2, 256, %s179_s29, [#allocation6], %s853_s5, %s853_s5, %s854_s6  }
  0x29   : > { %p1122_p11 = scmp.eq.s32.totalorder %s926_s23, 3  ;;  %p973_p10 = por %p52_p7, %p51_p6 }
  0x2a   : > { %p592_p13 = scmp.lt.s32.totalorder %s850_s22, 4  ;;  %s1148_s10 = smov (%p37_p9, %s1146_s10), 0 }
  0x2b   : > { %p969_p12 = por %p1122_p11, %p51_p6  ;;  %1126 = sst [smem:[#allocation17_spill]] %s1148_s10 }
  0x2c   : > { %s981_s24 = sand.u32 1, %s830_s17   ;;  %s547_s28 = sshll.u32 %s846_s21, 1 }
  0x2d   : > { %s1123_s13 = scalar_select %p969_p12, 1, 0 }
  0x2e   : > { %s39_s29 = ssub.s32 %s846_s21, %s1148_s10  ;;  %s546_s5 = sshll.u32 %s981_s24, 3 }
  0x2f   : > { %1124 = sst [smem:[#allocation16_spill]] %s1123_s13  ;;  %s41_s30 = sor.u32 %s40_s12, %s39_s29 }
  0x30   : > { %p42_p0 = scmp.eq.s32.totalorder %s41_s30, 0  ;;  %s204_s6 = sadd.s32 %s842_s20, %s547_s28 }
  0x31   : > { %s199_s7 = scalar_lea.vmem [#allocation2], %s546_s5  ;;  %s548_s9 = sshll.u32 %s204_s6, 7 }
  0x32   : > { %s208_s8 = sshll.u32 %s199_s7, 4  ;;  %s1127_s0 = sld [smem:[#allocation18_spill]]  ;;  %s209_s8 = int_to_ptr.vmem [resolvable:$true] %s208_s8 }
  0x33   : > { %s989_s2 = scalar_select %p42_p0, %s830_s17, %s44_s11  }
  0x34   : > { %p998_p3 = pnand %p592_p13, %p973_p10  ;;  %s215_s12 = sand.u32 1, %s850_s22  }
  0x35   : > { %s551_s28 = sshll.u32 %s204_s6, 5  ;;  %s196_s29 = scalar_lea.sflag [#allocation3], %s981_s24 }
  0x36   : > { %p692_p5 = pneg %p998_p3  ;;  %s703_s11 = scalar_lea.vmem %s209_s8, 128 }
  0x37   : > { %p704_p2 = scmp.ne.s32.totalorder %s209_s8, %s703_s11  ;;  %s855_s15 = smov [#allocation2]  }
  0x38   : > { %s206_s4 = scalar_lea.hbm %s1127_s0, %s548_s9  ;;  %s708_s26 = sshll.u32 %s855_s15, 4  ;;  %s709_s26 = int_to_ptr.vmem [resolvable:$false] %s708_s26 }
  0x39   : > { %p706_p6 = pnand %p704_p2, %p692_p5  ;;  %s710_s9 = scalar_lea.vmem %s709_s26, 256 }
  0x3a   : > { %p711_p9 = scmp.lt.s32.totalorder %s209_s8, %s709_s26  ;;  %p712_p11 = scmp.lt.s32.totalorder %s710_s9, %s703_s11 }
  0x3b   : > { %p707_p7 = pneg %p706_p6 }
  0x3c   : > { %p713_p10 = por %p712_p11, %p711_p9 }
  0x3e   : > { %p714_p13 = pnand %p713_p10, %p707_p7 }
  0x40   : > { %717 = shalt.err (!%p714_p13)
}
  0x41   : > { %583 = dma.hbm_to_vmem [thread:$0]  (!%p998_p3), %s206_s4, 128, %s209_s8, %s196_s29  }
  0x42   : > { %s549_s14 = sshll.u32 %s981_s24, 1  ;;  %s226_s6 = scalar_lea.hbm %s1101_s1, %s551_s28 }
  0x43   : > { %s219_s7 = scalar_lea.vmem [#allocation5], %s549_s14  ;;  %s216_s15 = scalar_lea.sflag [#allocation6], %s215_s12 }
  0x44   : > { %s228_s0 = sshll.u32 %s219_s7, 4  ;;  %s856_s11 = smov [#allocation5]   ;;  %s229_s0 = int_to_ptr.vmem [resolvable:$true] %s228_s0 }
  0x45   : > { %s731_s10 = scalar_lea.vmem %s229_s0, 32  ;;  %s736_s26 = sshll.u32 %s856_s11, 4  ;;  %s737_s26 = int_to_ptr.vmem [resolvable:$false] %s736_s26 }
  0x46   : > { %p732_p0 = scmp.ne.s32.totalorder %s229_s0, %s731_s10  ;;  %s738_s9 = scalar_lea.vmem %s737_s26, 64 }
  0x47   : > { %p739_p7 = scmp.lt.s32.totalorder %s229_s0, %s737_s26  ;;  %p740_p9 = scmp.lt.s32.totalorder %s738_s9, %s731_s10 }
  0x48   : > { %p734_p2 = pnand %p732_p0, %p692_p5 }
  0x49   : > { %p741_p11 = por %p740_p9, %p739_p7 }
  0x4a   : > { %p735_p6 = pneg %p734_p2 }
  0x4c   : > { %p742_p10 = pnand %p741_p11, %p735_p6 }
  0x4e   : > { %745 = shalt.err (!%p742_p10)
}
  0x4f   : > { %586 = dma.hbm_to_vmem [thread:$0]  (!%p998_p3), %s226_s6, 32, %s229_s0, %s216_s15  }
  0x50   : > { %237 = sbr.rel (%p945_p8) target bundleno = 237 (0xed), region = 36  ;;  %s1023_s4 = sand.u32 (!%p945_p8), 1, %s826_s16  }
  0x51   : > { %s553_s24 = sshll.u32 (!%p945_p8), %s1023_s4, 3  ;;  %s240_s8 = scalar_lea.sflag (!%p945_p8), [#allocation3], %s1023_s4 }
  0x52   : > { %s243_s10 = scalar_lea.vmem (!%p945_p8), [#allocation2], %s553_s24 }
  0x55   : > { %805 = dma.done.wait (%p935_p4), %s240_s8, 128  }
  0x56   : > { %807 = vsyncadd (%p935_p4), %s240_s8, 4294967168  ;;  %s248_s0 = sand.u32 1, %s926_s23   ;;  %s554_s27 = sshll.u32 %s1023_s4, 1 }
  0x57   : > { %s249_s13 = scalar_lea.sflag [#allocation6], %s248_s0  ;;  %s252_s12 = scalar_lea.vmem [#allocation5], %s554_s27 }
  0x58   : > { %809 = dma.done.wait (%p935_p4), %s249_s13, 32  }
  0x59   : > { %811 = vsyncadd (%p935_p4), %s249_s13, 4294967264 }
  0x5a   : > { %813 = dma.done.wait (%p58_p1), [#allocation6], 256  }
  0x5b   : > { %815 = vsyncadd (%p58_p1), [#allocation6], 4294967040  ;;  %v286_v0 = vld [vmem:[%s243_s10] sm:$0xff]  ;;  %s857_s28 = smov 8   ;;  %s858_s29 = smov 120   ;;  %v298_v2 = vlaneseq }
  0x5c   : > { %288 = vrot.lane.b32.xlu0 %v286_v0, %s857_s28  ;;  %290 = vrot.lane.b32.xlu1 %v286_v0, %s858_s29  ;;  %v287_v1 = vld [vmem:[%s252_s12] sm:$0x3]  ;;  %v350_v5 = vld [vmem:[#allocation7 + $0x7] sm:$0x1]  ;;  %v303_v6 = vld [vmem:[#allocation7 + $0x1] sm:$0x1] }
  0x5d   : > { %v1043_v3 = vshrl.u32 %v298_v2, 7  ;;  %v344_v7 = vld [vmem:[#allocation7 + $0x6] sm:$0x1]  ;;  %v297_v9 = vld [vmem:[#allocation7] sm:$0x1]  ;;  %v374_v18 = vrot.slane %v350_v5, 7  ;;  %v365_v29 = vmul.f32 %v303_v6, %v287_v1 }
  0x5e   : > { %v357_v10 = vld [vmem:[#allocation7 + $0x8] sm:$0x1]  ;;  %v310_v12 = vld [vmem:[#allocation7 + $0x2] sm:$0x1]  ;;  %v557_v14 = vld [vmem:[#allocation7 + $0x3] ss:$0 sm:$0xff] }
  0x5f   : > { %v300_v4 = vsub.s32 0, %v1043_v3  ;;  %v558_v23 = vld [vmem:[%s1103_s3] ss:$0 sm:$0xff]  ;;  %v559_v26 = vld [vmem:[#allocation7 + $0x4] ss:$0 sm:$0xff]  ;;  %v370_v27 = vrot.slane %v344_v7, 7  ;;  %v376_v33 = vmul.f32 %v374_v18, %v287_v1 }
  0x60   : > { %292 = vrot.lane.b32.xlu0 %v287_v1, %s857_s28  ;;  %294 = vrot.lane.b32.xlu1 %v287_v1, %s858_s29  ;;  %v379_v30 = vrot.slane %v357_v10, 7  ;;  %v335_v36 = vmul.f32 %v559_v26, %v286_v0  ;;  %v400_v42 = vsub.s32 1, %v1043_v3  ;;  %v560_v45 = vld [vmem:[#allocation7 + $0x5] ss:$0 sm:$0xff]  ;;  %s562_s14 = sshll.u32 %s838_s19, 1  ;;  %vm385_vm0 = vcmp.eq.s32.totalorder %v1043_v3, 0 }
  0x61   : > { %v354_v8 = vrot.slane %v350_v5, %v300_v4  ;;  %v307_v11 = vrot.slane %v303_v6, %v300_v4  ;;  %v348_v13 = vrot.slane %v344_v7, %v300_v4  ;;  %v301_v15 = vrot.slane %v297_v9, %v300_v4  ;;  %s418_s30 = sadd.s32 %s834_s18, %s562_s14  ;;  %s285_s6 = scalar_lea.vmem [#allocation8], %s553_s24 }
  0x62   : > { %v361_v17 = vrot.slane %v357_v10, %v300_v4  ;;  %v314_v19 = vrot.slane %v310_v12, %v300_v4  ;;  %vm394_vm1 = vcmp.eq.s32.totalorder %v1043_v3, 7  ;;  %s563_s19 = sshll.u32 %s418_s30, 7  ;;  %s422_s7 = sshll.u32 %s285_s6, 4  ;;  %s423_s7 = int_to_ptr.vmem [resolvable:$true] %s422_s7 }
  0x63   : > { %v355_v16 = vmul.f32 %v354_v8, %v286_v0  ;;  %v308_v22 = vmul.f32 %v307_v11, %v286_v0  ;;  %s1130_s26 = sld [smem:[#allocation20_spill]]  ;;  %s407_s18 = scalar_lea.sflag [#allocation4], %s1023_s4 }
  0x64   : > { %s746_s8 = scalar_lea.vmem %s423_s7, 128  ;;  %s859_s10 = smov [#allocation8]  }
  0x65   : > { %p747_p1 = scmp.ne.s32.totalorder %s423_s7, %s746_s8  ;;  %s750_s0 = sshll.u32 %s859_s10, 4  ;;  %s751_s0 = int_to_ptr.vmem [resolvable:$false] %s750_s0 }
  0x66   : > { %s752_s27 = scalar_lea.vmem %s751_s0, 256  ;;  %p753_p3 = scmp.lt.s32.totalorder %s423_s7, %s751_s0 }
  0x67   : > { %p748_p4 = pnand %p747_p1, %p969_p12  ;;  %p754_p5 = scmp.lt.s32.totalorder %s752_s27, %s746_s8 }
  0x69   : > { %s420_s9 = scalar_lea.hbm %s1130_s26, %s563_s19  ;;  %p749_p8 = pneg %p748_p4 }
  0x6a   : > { %p755_p13 = por %p754_p5, %p753_p3 }
  0x6c   : > { %p756_p0 = pnand %p755_p13, %p749_p8 }
  0xce   : > { %v289_v20 = vpop.permute.xlu0 %288  ;;  %v291_v21 = vpop.permute.xlu1 %290 }
  0xcf   : > { %v322_v24 = vmul.f32 %v557_v14, %v289_v20  ;;  %v349_v25 = vmul.f32 %v348_v13, %v289_v20  ;;  %v302_v28 = vmul.f32 %v301_v15, %v289_v20  ;;  %v362_v32 = vmul.f32 %v361_v17, %v291_v21 }
  0xd0   : > { %v315_v34 = vmul.f32 %v314_v19, %v291_v21  ;;  %v342_v53 = vmul.f32 %v560_v45, %v291_v21 }
  0xd1   : > { %v356_v31 = vadd.f32 %v355_v16, %v349_v25  ;;  %v329_v35 = vadd.f32 %v558_v23, %v322_v24  ;;  %v309_v38 = vadd.f32 %v308_v22, %v302_v28 }
  0xd2   : > { %v293_v37 = vpop.permute.xlu0 %292  ;;  %v295_v39 = vpop.permute.xlu1 %294 }
  0xd3   : > { %v364_v40 = vmul.f32 %v297_v9, %v293_v37  ;;  %v372_v41 = vmul.f32 %v370_v27, %v293_v37  ;;  %v367_v43 = vmul.f32 %v310_v12, %v295_v39  ;;  %v381_v44 = vmul.f32 %v379_v30, %v295_v39 }
  0xd4   : > { %v363_v46 = vadd.f32 %v362_v32, %v356_v31  ;;  %v316_v49 = vadd.f32 %v315_v34, %v309_v38  ;;  %v336_v50 = vadd.f32 %v335_v36, %v329_v35 }
  0xd5   : > { %v366_v47 = vadd.f32 %v365_v29, %v364_v40  ;;  %v377_v48 = vadd.f32 %v376_v33, %v372_v41 }
  0xd6   : > { %v395_v54 = vrot.slane %v363_v46, 1  ;;  %v386_v55 = vrot.slane %v316_v49, 7  ;;  %v343_v58 = vadd.f32 %v342_v53, %v336_v50 }
  0xd7   : > { %v368_v51 = vadd.f32 %v367_v43, %v366_v47  ;;  %v382_v52 = vadd.f32 %v381_v44, %v377_v48 }
  0xd9   : > { %v392_v56 = vrot.slane %v368_v51, %v300_v4  ;;  %v401_v57 = vrot.slane %v382_v52, %v400_v42 }
  0xdb   : > { %v393_v59 = vsel %vm385_vm0, %v392_v56, %v386_v55  ;;  %v402_v60 = vsel %vm394_vm1, %v401_v57, %v395_v54 }
  0xdc   : > { %v403_v61 = vadd.f32 %v393_v59, %v343_v58 }
  0xde   : > { %v404_v62 = vadd.f32 %v403_v61, %v402_v60 }
  0xe0   : > { %405 = vst [vmem:[%s285_s6] sm:$0xff] %v404_v62 }
  0xe1   : > { %759 = shalt.err (!%p756_p0)
}
  0xe2   : > { %s760_s24 = scalar_lea.hbm %s420_s9, 128  ;;  %s764_s12 = scalar_lea.hbm %s1130_s26, 512 }
  0xe3   : > { %p761_p2 = scmp.ne.s32.totalorder %s420_s9, %s760_s24  ;;  %p765_p9 = scmp.lt.s32.totalorder %s420_s9, %s1130_s26 }
  0xe4   : > { %p766_p11 = scmp.lt.s32.totalorder %s764_s12, %s760_s24 }
  0xe5   : > { %p762_p6 = pnand %p761_p2, %p969_p12 }
  0xe6   : > { %p767_p10 = por %p766_p11, %p765_p9 }
  0xe7   : > { %p763_p7 = pneg %p762_p6 }
  0xe9   : > { %p768_p1 = pnand %p767_p10, %p763_p7 }
  0xeb   : > { %771 = shalt.err (!%p768_p1)
}
  0xec   : > { %574 = dma.vmem_to_hbm [thread:$0]  (%p969_p12), %s423_s7, 128, %s420_s9, %s407_s18  }
  0xed PF: > { %s1131_s23 = sld [smem:[#allocation13_spill]]  ;;  %p594_p4 = scmp.ge.s32.totalorder %s850_s22, 2 }
  0xee   : > { %s1132_s25 = sld [smem:[#allocation14_spill]] }
  0xf3   : > { %s434_s14 = sand.u32 1, %s1131_s23  }
  0xf4   : > { %p1133_p8 = scmp.ne.s32.totalorder %s1132_s25, 0  ;;  %s435_s30 = scalar_lea.sflag [#allocation4], %s434_s14 }
  0xf6   : > { %p588_p3 = pnand %p594_p4, %p1133_p8 }
  0xf8   : > { %p589_p5 = pneg %p588_p3 }
  0xfa   : > { %817 = dma.done.wait (%p589_p5), %s435_s30, 128  }
  0xfb   : > { %819 = vsyncadd (%p589_p5), %s435_s30, 4294967168  ;;  %s23_s22 = sadd.s32 1, %s850_s22   ;;  %s1134_s5 = sld [smem:[#allocation15_spill]] }
  0xfc   : > { %p20_p13 = scmp.ge.s32.totalorder %s23_s22, 6   ;;  %s1135_s6 = sld [smem:[#allocation17_spill]] }
  0xfd   : > { %s1136_s15 = smov %s826_s16  ;;  %s1137_s16 = smov %s830_s17 }
  0xfe   : > { %s1138_s17 = smov %s989_s2  ;;  %s1139_s18 = smov %s842_s20 }
  0xff   : > { %s1140_s19 = smov %s846_s21  ;;  %22 = sbr.rel (!%p20_p13) target bundleno = 13 (0xd), region = 98 }
 0x101   : > { %s1141_s20 = smov %s1134_s5 }
 0x102   : > { %s1142_s21 = smov %s1135_s6 }
 0x104   :  { %440 = vsyncpa [#allocation3], 1 }
 0x105   :  { %442 = vsyncpa [#allocation3 + $0x1], 1 }
 0x106   :  { %443 = vsyncpa [#allocation6], 1 }
 0x107   :  { %445 = vsyncpa [#allocation6 + $0x1], 1 }
 0x108   :  { %446 = vsyncpa [#allocation4], 1 }
 0x109   :  { %448 = vsyncpa [#allocation4 + $0x1], 1 }

</bundles_post_ra>
